<compile_context>
chip_gen: v6e
topology: v6e:2x2x1
jax: 0.10.0
libtpu: 0.0.40
codegen_flags: <defaults>
</compile_context>

<pallas_src>
import functools
import math

import jax
import jax.numpy as jnp
from jax import lax
from jax.experimental import pallas as pl
from jax.experimental.pallas import tpu as pltpu

# Finite stand-in for -inf when masking attention scores (keeps the online softmax NaN-free).
MASK_PENALTY = 1e30

# Matmul operand dtype. f32 keeps numerics faithful to the PyTorch reference; set to
# jnp.bfloat16 on v6e/v7x for ~2x MXU throughput (accumulation stays f32 either way).
MATMUL_DTYPE = jnp.float32

VMEM_LIMIT = 64 * 1024 * 1024   # fits v7x's 64 MiB physical VMEM as well as v5e/v6e


def _mm(a, b):
    """2-D matmul on the MXU with f32 accumulation."""
    return jnp.dot(a.astype(MATMUL_DTYPE), b.astype(MATMUL_DTYPE),
                   preferred_element_type=jnp.float32)


def _pick_tile(n, target, align=8):
    """Largest tile t <= target with n % t == 0 and (t == n or t % align == 0)."""
    if n <= target:
        return n
    for t in range(target, 0, -1):
        if n % t == 0 and t % align == 0:
            return t
    return n


# ----------------------------- fused K/V projection kernel -------------------------------

def _kv_proj_kernel(x_ref, wkv_ref, bkv_ref, k_ref, v_ref, *, hidden):
    x = x_ref[0]                                                     # [TT, H]
    kv = _mm(x, wkv_ref[...]) + bkv_ref[...]                         # one [H,2H] matmul
    k_ref[0] = kv[:, :hidden].astype(k_ref.dtype)
    v_ref[0] = kv[:, hidden:].astype(v_ref.dtype)


def _kv_projection(x, p):
    """linear_k / linear_v of `x` [B,T,H]; outputs double as the returned KV cache."""
    B, T, H = x.shape
    tt = _pick_tile(T, 256, align=8)
    wkv = jnp.concatenate([p["wk"], p["wv"]], axis=1)                # [H, 2H]
    bkv = jnp.concatenate([p["bk"], p["bv"]], axis=1)                # [1, 2H]
    xspec = pl.BlockSpec((1, tt, H), lambda b, t: (b, t, 0))
    k_proj, v_proj = pl.pallas_call(
        functools.partial(_kv_proj_kernel, hidden=H),
        grid=(B, T // tt),
        in_specs=[xspec,
                  pl.BlockSpec((H, 2 * H), lambda b, t: (0, 0)),
                  pl.BlockSpec((1, 2 * H), lambda b, t: (0, 0))],
        out_specs=[xspec, xspec],
        out_shape=[jax.ShapeDtypeStruct((B, T, H), x.dtype),
                   jax.ShapeDtypeStruct((B, T, H), x.dtype)],
        compiler_params=pltpu.CompilerParams(
            dimension_semantics=("parallel", "parallel"),
            vmem_limit_bytes=VMEM_LIMIT),
    )(x, wkv, bkv)
    return k_proj, v_proj


# ----------------------------- fused flash attention kernel -----------------------------

def _flash_attn_kernel(q_ref, k_ref, v_ref, wq_ref, bq_ref, wo_ref, bo_ref,
                       gamma_ref, beta_ref, amask_ref, kmask_ref, keep_ref, o_ref,
                       q_scr, m_scr, l_scr, acc_scr,
                       *, num_heads, dim_head, scale, eps):
    ki = pl.program_id(2)

    # ---- first KV tile: project Q once per query tile, reset online-softmax state ----
    @pl.when(ki == 0)
    def _init():
        q_scr[...] = (_mm(q_ref[0], wq_ref[...]) + bq_ref[...]) * scale  # linear_q / sqrt(Dh)
        m_scr[...] = jnp.full(m_scr.shape, -MASK_PENALTY, jnp.float32)
        l_scr[...] = jnp.zeros(l_scr.shape, jnp.float32)
        acc_scr[...] = jnp.zeros(acc_scr.shape, jnp.float32)

    k_t = k_ref[0]                                                   # [TK, H]
    v_t = v_ref[0]                                                   # [TK, H]
    allow = amask_ref[...] * kmask_ref[0]                            # [TQ, TK], 1=attend
    penalty = (1.0 - allow) * MASK_PENALTY                           # hoisted out of head loop

    for h in range(num_heads):                                       # static head loop
        sl = slice(h * dim_head, (h + 1) * dim_head)
        s = lax.dot_general(                                         # q_h @ k_h.T -> [TQ, TK]
            q_scr[:, sl].astype(MATMUL_DTYPE), k_t[:, sl].astype(MATMUL_DTYPE),
            (((1,), (1,)), ((), ())), preferred_element_type=jnp.float32)
        s = s - penalty
        m_prev = m_scr[h]                                            # [TQ, 1]
        m_new = jnp.maximum(m_prev, jnp.max(s, axis=-1, keepdims=True))
        alpha = jnp.exp(m_prev - m_new)
        p = jnp.exp(s - m_new)                                       # masked entries -> 0
        l_scr[h] = alpha * l_scr[h] + jnp.sum(p, axis=-1, keepdims=True)
        acc_scr[:, sl] = alpha * acc_scr[:, sl] + _mm(p, v_t[:, sl])
        m_scr[h] = m_new

    # ---- last KV tile: normalize, out-projection + residual + LayerNorm epilogue ----
    @pl.when(ki == pl.num_programs(2) - 1)
    def _finalize():
        inv_l = pl.reciprocal(l_scr[...], approx=False)              # [N, TQ, 1]
        valid = (m_scr[...] > -0.5 * MASK_PENALTY).astype(jnp.float32)
        norm = inv_l * valid                                         # fully-masked rows -> 0
        for h in range(num_heads):                                   # normalize context in-place
            sl = slice(h * dim_head, (h + 1) * dim_head)
            acc_scr[:, sl] = acc_scr[:, sl] * norm[h]
        out = _mm(acc_scr[...], wo_ref[...]) + bo_ref[...]           # linear_out
        z = q_ref[0].astype(jnp.float32) + out                       # residual add
        mean = jnp.mean(z, axis=-1, keepdims=True)
        c = z - mean
        var = jnp.mean(c * c, axis=-1, keepdims=True)
        y = c * lax.rsqrt(var + eps) * gamma_ref[...] + beta_ref[...]
        # TODO(synk): MaskedLayerNorm source not provided; assuming plain LayerNorm
        # followed by zero-fill of ignored positions.
        o_ref[0] = (y * keep_ref[0]).astype(o_ref.dtype)


def _attention_block(query, k_proj, v_proj, p, ln_p, attn_allow, key_allow, keep,
                     num_heads, eps):
    """softmax(QK^T/sqrt(Dh)+mask) V -> linear_out -> +residual(query) -> LayerNorm."""
    B, S, H = query.shape
    T = k_proj.shape[1]
    dim_head = H // num_heads
    scale = 1.0 / math.sqrt(dim_head)
    tq = _pick_tile(S, 256, align=8)
    tk = _pick_tile(T, 512, align=128)   # last dim of the mask blocks -> 128-aligned

    kernel = functools.partial(_flash_attn_kernel, num_heads=num_heads,
                               dim_head=dim_head, scale=scale, eps=eps)
    wspec = pl.BlockSpec((H, H), lambda b, qi, ki: (0, 0))
    bspec = pl.BlockSpec((1, H), lambda b, qi, ki: (0, 0))
    return pl.pallas_call(
        kernel,
        grid=(B, S // tq, T // tk),
        in_specs=[
            pl.BlockSpec((1, tq, H), lambda b, qi, ki: (b, qi, 0)),   # query / residual
            pl.BlockSpec((1, tk, H), lambda b, qi, ki: (b, ki, 0)),   # K (pre-projected)
            pl.BlockSpec((1, tk, H), lambda b, qi, ki: (b, ki, 0)),   # V (pre-projected)
            wspec, bspec,                                             # linear_q
            wspec, bspec,                                             # linear_out
            bspec, bspec,                                             # LayerNorm gamma/beta
            pl.BlockSpec((tq, tk), lambda b, qi, ki: (qi, ki)),       # attention allow-mask
            pl.BlockSpec((1, 1, tk), lambda b, qi, ki: (b, 0, ki)),   # key-ignorance allow
            pl.BlockSpec((1, tq, 1), lambda b, qi, ki: (b, qi, 0)),   # ignorance keep-mask
        ],
        out_specs=pl.BlockSpec((1, tq, H), lambda b, qi, ki: (b, qi, 0)),
        out_shape=jax.ShapeDtypeStruct((B, S, H), query.dtype),
        scratch_shapes=[
            pltpu.VMEM((tq, H), jnp.float32),             # projected, scaled Q slab
            pltpu.VMEM((num_heads, tq, 1), jnp.float32),  # running max per head
            pltpu.VMEM((num_heads, tq, 1), jnp.float32),  # running denominator per head
            pltpu.VMEM((tq, H), jnp.float32),             # running context slab [TQ, H]
        ],
        compiler_params=pltpu.CompilerParams(
            dimension_semantics=("parallel", "parallel", "arbitrary"),
            vmem_limit_bytes=VMEM_LIMIT),
    )(query, k_proj, v_proj, p["wq"], p["bq"], p["wo"], p["bo"],
      ln_p["gamma"], ln_p["beta"], attn_allow, key_allow, keep)


# ----------------------------- fused FFN kernel ------------------------------------------

def _ffn_kernel(x_ref, w1_ref, b1_ref, w2_ref, b2_ref, gamma_ref, beta_ref, keep_ref,
                o_ref, *, eps):
    x = x_ref[...].astype(jnp.float32)                       # [TM, H]
    h = _mm(x, w1_ref[...]) + b1_ref[...]                    # lin_expand
    h = jax.nn.gelu(h, approximate=False)                    # nn.GELU() = exact erf GELU
    y = _mm(h, w2_ref[...]) + b2_ref[...]                    # lin_collapse
    z = x + y                                                # residual add
    mean = jnp.mean(z, axis=-1, keepdims=True)
    c = z - mean
    var = jnp.mean(c * c, axis=-1, keepdims=True)
    out = c * lax.rsqrt(var + eps) * gamma_ref[...] + beta_ref[...]
    o_ref[...] = (out * keep_ref[...]).astype(o_ref.dtype)


def _ffn_block(x, p, ln_p, keep, eps):
    B, S, H = x.shape
    inter = p["w1"].shape[1]
    M = B * S
    tm = _pick_tile(M, 256, align=8)
    x2d = x.reshape(M, H)
    keep2d = keep.reshape(M, 1)
    const2 = lambda i: (0, 0)
    out = pl.pallas_call(
        functools.partial(_ffn_kernel, eps=eps),
        grid=(M // tm,),
        in_specs=[
            pl.BlockSpec((tm, H), lambda i: (i, 0)),
            pl.BlockSpec((H, inter), const2), pl.BlockSpec((1, inter), const2),
            pl.BlockSpec((inter, H), const2), pl.BlockSpec((1, H), const2),
            pl.BlockSpec((1, H), const2), pl.BlockSpec((1, H), const2),
            pl.BlockSpec((tm, 1), lambda i: (i, 0)),
        ],
        out_specs=pl.BlockSpec((tm, H), lambda i: (i, 0)),
        out_shape=jax.ShapeDtypeStruct((M, H), x.dtype),
        compiler_params=pltpu.CompilerParams(
            dimension_semantics=("parallel",),
            vmem_limit_bytes=VMEM_LIMIT),
    )(x2d, p["w1"], p["b1"], p["w2"], p["b2"], ln_p["gamma"], ln_p["beta"], keep2d)
    return out.reshape(B, S, H)


# ----------------------------- layer wrapper ---------------------------------------------

def _build_allow_masks(B, S, T, attention_mask, key_ignorance_mask):
    """Compact multiplicative masks (1=attend, 0=mask); no dense [B,S,T] bias tensor."""
    if attention_mask is not None:                        # [S, T] bool, True = masked
        attn_allow = 1.0 - attention_mask.astype(jnp.float32)
    else:
        attn_allow = jnp.ones((S, T), jnp.float32)
    if key_ignorance_mask is not None:                    # [B, T] bool, True = masked
        key_allow = (1.0 - key_ignorance_mask.astype(jnp.float32)).reshape(B, 1, T)
    else:
        key_allow = jnp.ones((B, 1, T), jnp.float32)
    return attn_allow, key_allow


def transformer_layer(params, target,
                      target_ignorance_mask=None, target_attention_mask=None,
                      memory=None, memory_ignorance_mask=None,
                      memory_attention_mask=None,
                      num_heads=8, layernorm_eps=1e-12):
    """Non-cached TransformerLayer.forward (training=False, prev_key_value=None)."""
    # TODO(synk): incremental-decode cache path (prev_key_value) and cross_only mode are
    # not implemented; this is the standard non-cached encoder/decoder forward.
    B, T, H = target.shape
    dim_head = H // num_heads

    if target_ignorance_mask is not None:
        keep = (1.0 - target_ignorance_mask.astype(jnp.float32)).reshape(B, T, 1)
    else:
        keep = jnp.ones((B, T, 1), jnp.float32)

    new_kv_tuples = ()

    # ---- self-attention block (self.attn) ----
    p = params["attn"]
    k_proj, v_proj = _kv_projection(target, p)
    attn_allow, key_allow = _build_allow_masks(B, T, T, target_attention_mask,
                                               target_ignorance_mask)
    target = _attention_block(target, k_proj, v_proj, p, params["norm_attn"],
                              attn_allow, key_allow, keep, num_heads, layernorm_eps)
    new_value = jnp.transpose(v_proj.reshape(B, T, num_heads, dim_head), (0, 2, 1, 3))
    new_kv_tuples += ((k_proj, new_value),)               # same tensors attention used

    # ---- cross-attention block (self.mem) ----
    if memory is not None:
        S_mem = memory.shape[1]
        p = params["mem"]
        k_proj, v_proj = _kv_projection(memory, p)
        attn_allow, key_allow = _build_allow_masks(B, T, S_mem, memory_attention_mask,
                                                   memory_ignorance_mask)
        target = _attention_block(target, k_proj, v_proj, p, params["norm_mem"],
                                  attn_allow, key_allow, keep, num_heads, layernorm_eps)
        new_value = jnp.transpose(v_proj.reshape(B, S_mem, num_heads, dim_head),
                                  (0, 2, 1, 3))
        new_kv_tuples += ((k_proj, new_value),)

    # ---- feed-forward block (fused with final residual + LayerNorm) ----
    target = _ffn_block(target, params["ffn"], params["norm_out"], keep, layernorm_eps)
    return target, new_kv_tuples


# ----------------------------- parameter init --------------------------------------------

def _init_linear(key, d_in, d_out, scale=0.02):
    kw, kb = jax.random.split(key)
    w = jax.random.normal(kw, (d_in, d_out), jnp.float32) * scale
    b = jax.random.normal(kb, (1, d_out), jnp.float32) * scale
    return w, b


def init_params(key, hidden_dim, intermediate_dim):
    keys = jax.random.split(key, 12)

    def attn_params(k4):
        wq, bq = _init_linear(k4[0], hidden_dim, hidden_dim)
        wk, bk = _init_linear(k4[1], hidden_dim, hidden_dim)
        wv, bv = _init_linear(k4[2], hidden_dim, hidden_dim)
        wo, bo = _init_linear(k4[3], hidden_dim, hidden_dim)
        return dict(wq=wq, bq=bq, wk=wk, bk=bk, wv=wv, bv=bv, wo=wo, bo=bo)

    def ln_params():
        return dict(gamma=jnp.ones((1, hidden_dim), jnp.float32),
                    beta=jnp.zeros((1, hidden_dim), jnp.float32))

    w1, b1 = _init_linear(keys[8], hidden_dim, intermediate_dim)
    w2, b2 = _init_linear(keys[9], intermediate_dim, hidden_dim)
    return dict(
        attn=attn_params(keys[0:4]),
        mem=attn_params(keys[4:8]),
        ffn=dict(w1=w1, b1=b1, w2=w2, b2=b2),
        norm_attn=ln_params(),
        norm_mem=ln_params(),
        norm_out=ln_params(),
    )


# ----------------------------- main -------------------------------------------------------

if __name__ == "__main__":
    B, T, S_MEM = 2, 8, 8
    HIDDEN, INTER, HEADS = 128, 256, 8

    root = jax.random.PRNGKey(0)
    k_params, k_tgt, k_mem = jax.random.split(root, 3)

    params = init_params(k_params, HIDDEN, INTER)
    target = jax.random.normal(k_tgt, (B, T, HIDDEN), jnp.float32)
    memory = jax.random.normal(k_mem, (B, S_MEM, HIDDEN), jnp.float32)

    causal_mask = jnp.triu(jnp.ones((T, T), jnp.bool_), k=1)              # mask future keys
    target_ignorance = jnp.zeros((B, T), jnp.bool_).at[1, -2:].set(True)  # padding positions
    memory_ignorance = jnp.zeros((B, S_MEM), jnp.bool_).at[0, -1].set(True)

    out, new_kv = transformer_layer(
        params, target,
        target_ignorance_mask=target_ignorance,
        target_attention_mask=causal_mask,
        memory=memory,
        memory_ignorance_mask=memory_ignorance,
        memory_attention_mask=None,
        num_heads=HEADS,
        layernorm_eps=1e-12,
    )
    jax.block_until_ready(out)
    print("KERNEL_OK")
</pallas_src>

<mosaic_0001>
module attributes {stable_mosaic.version = 11 : i64} {
  func.func @_kv_proj_kernel(%arg0: i32, %arg1: i32, %arg2: memref<1x8x128xf32, #tpu.memory_space<vmem>>, %arg3: memref<128x256xf32, #tpu.memory_space<vmem>>, %arg4: memref<1x256xf32, #tpu.memory_space<vmem>>, %arg5: memref<1x8x128xf32, #tpu.memory_space<vmem>>, %arg6: memref<1x8x128xf32, #tpu.memory_space<vmem>>) attributes {dimension_semantics = [#tpu.dimension_semantics<parallel>, #tpu.dimension_semantics<parallel>], iteration_bounds = array<i64: 2, 1>, scalar_prefetch = 0 : i64, scratch_operands = 0 : i64, tpu.core_type = #tpu.core_type<tc>, window_params = [{transform_indices = @transform_0, window_bounds = array<i64: 1, 8, 128>}, {pipeline_mode = #tpu.pipeline_mode<synchronous>, transform_indices = @transform_1, window_bounds = array<i64: 128, 256>}, {pipeline_mode = #tpu.pipeline_mode<synchronous>, transform_indices = @transform_2, window_bounds = array<i64: 1, 256>}, {transform_indices = @transform_3, window_bounds = array<i64: 1, 8, 128>}, {transform_indices = @transform_4, window_bounds = array<i64: 1, 8, 128>}]} {
    %c0 = arith.constant 0 : index
    %c0_0 = arith.constant 0 : index
    %c0_1 = arith.constant 0 : index
    %0 = vector.load %arg2[%c0, %c0_0, %c0_1] : memref<1x8x128xf32, #tpu.memory_space<vmem>>, vector<1x8x128xf32>
    %1 = vector.shape_cast %0 : vector<1x8x128xf32> to vector<8x128xf32>
    %c0_2 = arith.constant 0 : index
    %c0_3 = arith.constant 0 : index
    %2 = vector.load %arg3[%c0_2, %c0_3] : memref<128x256xf32, #tpu.memory_space<vmem>>, vector<128x256xf32>
    %cst = arith.constant dense<0.000000e+00> : vector<8x256xf32>
    %3 = tpu.matmul %1, %2, %cst {dimension_numbers = #tpu.dot_dimension_numbers<[1], [0], [0], [1], [0, 0, 1, 1], [], []>} : vector<8x128xf32>, vector<128x256xf32>, vector<8x256xf32> -> vector<8x256xf32>
    %c0_4 = arith.constant 0 : index
    %c0_5 = arith.constant 0 : index
    %4 = vector.load %arg4[%c0_4, %c0_5] : memref<1x256xf32, #tpu.memory_space<vmem>>, vector<1x256xf32>
    %5 = vector.broadcast %4 : vector<1x256xf32> to vector<8x256xf32>
    %6 = arith.addf %3, %5 : vector<8x256xf32>
    %7 = vector.extract_strided_slice %6 {offsets = [0, 0], sizes = [8, 128], strides = [1, 1]} : vector<8x256xf32> to vector<8x128xf32>
    %c0_6 = arith.constant 0 : index
    %c0_7 = arith.constant 0 : index
    %c0_8 = arith.constant 0 : index
    %8 = vector.load %arg5[%c0_6, %c0_7, %c0_8] : memref<1x8x128xf32, #tpu.memory_space<vmem>>, vector<1x8x128xf32>
    %9 = vector.shape_cast %8 : vector<1x8x128xf32> to vector<8x128xf32>
    %10 = vector.shape_cast %7 : vector<8x128xf32> to vector<1x8x128xf32>
    tpu.vector_store %arg5[%c0_6, %c0_7, %c0_8], %10 {strides = array<i32>} : memref<1x8x128xf32, #tpu.memory_space<vmem>>, vector<1x8x128xf32>,
    %11 = vector.extract_strided_slice %6 {offsets = [0, 128], sizes = [8, 128], strides = [1, 1]} : vector<8x256xf32> to vector<8x128xf32>
    %c0_9 = arith.constant 0 : index
    %c0_10 = arith.constant 0 : index
    %c0_11 = arith.constant 0 : index
    %12 = vector.load %arg6[%c0_9, %c0_10, %c0_11] : memref<1x8x128xf32, #tpu.memory_space<vmem>>, vector<1x8x128xf32>
    %13 = vector.shape_cast %12 : vector<1x8x128xf32> to vector<8x128xf32>
    %14 = vector.shape_cast %11 : vector<8x128xf32> to vector<1x8x128xf32>
    tpu.vector_store %arg6[%c0_9, %c0_10, %c0_11], %14 {strides = array<i32>} : memref<1x8x128xf32, #tpu.memory_space<vmem>>, vector<1x8x128xf32>,
    return
  }
  func.func @transform_0(%arg0: i32, %arg1: i32) -> (i32, i32, i32) {
    %c0_i32 = arith.constant 0 : i32
    %c0_i32_0 = arith.constant 0 : i32
    return %arg0, %arg1, %c0_i32 : i32, i32, i32
  }
  func.func @transform_1(%arg0: i32, %arg1: i32) -> (i32, i32) {
    %c0_i32 = arith.constant 0 : i32
    %c0_i32_0 = arith.constant 0 : i32
    %c0_i32_1 = arith.constant 0 : i32
    return %c0_i32, %c0_i32_0 : i32, i32
  }
  func.func @transform_2(%arg0: i32, %arg1: i32) -> (i32, i32) {
    %c0_i32 = arith.constant 0 : i32
    %c0_i32_0 = arith.constant 0 : i32
    %c0_i32_1 = arith.constant 0 : i32
    return %c0_i32, %c0_i32_0 : i32, i32
  }
  func.func @transform_3(%arg0: i32, %arg1: i32) -> (i32, i32, i32) {
    %c0_i32 = arith.constant 0 : i32
    %c0_i32_0 = arith.constant 0 : i32
    return %arg0, %arg1, %c0_i32 : i32, i32, i32
  }
  func.func @transform_4(%arg0: i32, %arg1: i32) -> (i32, i32, i32) {
    %c0_i32 = arith.constant 0 : i32
    %c0_i32_0 = arith.constant 0 : i32
    return %arg0, %arg1, %c0_i32 : i32, i32, i32
  }
}

</mosaic_0001>

<bundles_post_ra>
// kernel: tpu_custom_call.1
= control target key start
LH: loop header
LB: loop body
LE: loop exit
PB: predicated region body
PF: predicated region fallthrough
CT: control target
= control target key end

     0   :  { %s1055_s0 = inlined_call_operand.hbm [shape: f32[2,8,128], index: 0, kind: input, shape index: {}]   ;;  %s1056_s1 = inlined_call_operand.hbm [shape: f32[128,256], index: 1, kind: input, shape index: {}]   ;;  %s1057_s2 = inlined_call_operand.vmem [shape: f32[1,256], index: 2, kind: input, shape index: {}]   ;;  %s1058_s3 = inlined_call_operand.hbm [shape: f32[2,8,128], index: 3, kind: output, shape index: {0}]   ;;  %s1059_s4 = inlined_call_operand.hbm [shape: f32[2,8,128], index: 4, kind: output, shape index: {1}]  }
   0x1   :  { %1061 = sst [smem:[#allocation14_spill]] %s1056_s1 }
   0x2   :  { %10 = vsyncpa [#allocation3], 0 }
   0x3   :  { %12 = vsyncpa [#allocation3 + $0x1], 0 }
   0x4   :  { %13 = vsyncpa [#allocation6], 0 }
   0x5   :  { %14 = vsyncpa [#allocation4], 0 }
   0x6   :  { %16 = vsyncpa [#allocation4 + $0x1], 0 }
   0x7   :  { %17 = vsyncpa [#allocation9], 0 }
   0x8   :  { %19 = vsyncpa [#allocation9 + $0x1], 0  ;;  %s834_s15 = smov 0   ;;  %s836_s16 = smov 0  }
   0x9   :  { %s838_s17 = smov 0   ;;  %s840_s18 = smov 0  }
   0xa   :  { %s842_s19 = smov 0   ;;  %s844_s20 = smov 0  }
   0xb LB: > { %s533_s21 = sadd.s32 4294967295, %s800_s20   ;;  %s534_s22 = sadd.s32 4294967294, %s800_s20   ;;  %s800_s20 = sphi %s844_s20, %s25_s20   ;;  %s796_s19 = sphi %s842_s19, %s1079_s19   ;;  %s792_s18 = sphi %s840_s18, %s1078_s18   ;;  %s788_s17 = sphi %s838_s17, %s1077_s17   ;;  %s784_s16 = sphi %s836_s16, %s1076_s16   ;;  %s780_s15 = sphi %s834_s15, %s1075_s15  }
   0xc   : > { %p59_p0 = scmp.ne.s32.totalorder %s784_s16, %s780_s15  ;;  %p868_p1 = scmp.eq.s32.totalorder %s533_s21, 0 }
   0xd   : > { %p872_p2 = scmp.eq.s32.totalorder %s533_s21, 1  ;;  %p133_p3 = scmp.eq.s32.totalorder %s534_s22, 1 }
   0xe   : > { %p878_p4 = por %p868_p1, %p59_p0  ;;  %p535_p5 = scmp.ge.s32.totalorder %s800_s20, 1 }
   0xf   : > { %p883_p6 = por %p133_p3, %p59_p0  ;;  %p168_p7 = scmp.lt.s32.totalorder %s800_s20, 3 }
  0x10   : > { %s1064_s25 = scalar_select %p878_p4, 1, 0 }
  0x11   : > { %s1065_s26 = scalar_select %p883_p6, 1, 0 }
  0x12   : > { %p888_p8 = pnand %p535_p5, %p168_p7  ;;  %s802_s28 = smov [#allocation5]  }
  0x13   : > { %s180_s29 = sshll.u32 %s802_s28, 4  ;;  %s37_s5 = sadd.s32 1, %s796_s19  ;;  %s181_s29 = int_to_ptr.vmem [resolvable:$true] %s180_s29 }
  0x14   : > { %p561_p9 = pneg %p888_p8  ;;  %s643_s6 = scalar_lea.vmem %s181_s29, 4096 }
  0x15   : > { %p644_p13 = scmp.ne.s32.totalorder %s181_s29, %s643_s6  ;;  %p651_p5 = scmp.lt.s32.totalorder %s181_s29, %s181_s29 }
  0x16   : > { %p897_p11 = pnand %p561_p9, %p868_p1  ;;  %p652_p7 = scmp.lt.s32.totalorder %s643_s6, %s643_s6 }
  0x18   : > { %p634_p12 = pneg %p897_p11  ;;  %p653_p6 = por %p652_p7, %p651_p5 }
  0x1a   : > { %p646_p0 = pnand %p644_p13, %p634_p12 }
  0x1c   : > { %p647_p3 = pneg %p646_p0 }
  0x1e   : > { %p654_p4 = pnand %p653_p6, %p647_p3 }
  0x20   : > { %657 = shalt.err (!%p654_p4)
}
  0x21   : > { %s803_s7 = smov 256   ;;  %s804_s8 = smov 16  }
  0x22   : > { %s1068_s1 = sld [smem:[#allocation14_spill]]  ;;  %p39_p6 = scmp.ge.s32.totalorder %s37_s5, 2 }
  0x23   : > { %s46_s11 = sadd.s32 1, %s788_s17  ;;  %p53_p4 = scmp.ne.s32.totalorder %s788_s17, %s784_s16 }
  0x24   : > { %p54_p9 = scmp.eq.s32.totalorder %s800_s20, 0  ;;  %s1081_s5 = smov (%p39_p6, %s37_s5), 0 }
  0x25   : > { %p921_p13 = por %p872_p2, %p53_p4  ;;  %s41_s14 = ssub.s32 %s796_s19, %s1081_s5 }
  0x26   : > { %p915_p12 = por %p54_p9, %p53_p4  ;;  %p577_p0 = scmp.lt.s32.totalorder %s800_s20, 2 }
  0x27   : > { %s197_s21 = sand.u32 1, %s788_s17  }
  0x28   : > { %564 = dma.hbm_to_vmem [thread:$0]  (!%p897_p11), %s1068_s1, 4096, %s181_s29, [#allocation6], %s803_s7, %s803_s7, %s804_s8  }
  0x29   : > { %p44_p11 = scmp.eq.s32.totalorder %s41_s14, 0  ;;  %s538_s22 = sshll.u32 %s197_s21, 3 }
  0x2a   : > { %s539_s29 = sshll.u32 %s796_s19, 7  ;;  %s201_s8 = scalar_lea.vmem [#allocation2], %s538_s22 }
  0x2b   : > { %s930_s28 = scalar_select %p44_p11, %s788_s17, %s46_s11  }
  0x2c   : > { %s207_s7 = scalar_lea.hbm %s1055_s0, %s539_s29  ;;  %s209_s9 = sshll.u32 %s201_s8, 4  ;;  %s210_s9 = int_to_ptr.vmem [resolvable:$true] %s209_s9 }
  0x2d   : > { %p938_p2 = pnand %p577_p0, %p915_p12  ;;  %s198_s10 = scalar_lea.sflag [#allocation3], %s197_s21 }
  0x2e   : > { %s671_s14 = scalar_lea.vmem %s210_s9, 128  ;;  %s805_s11 = smov [#allocation2]  }
  0x2f   : > { %p660_p3 = pneg %p938_p2  ;;  %p672_p5 = scmp.ne.s32.totalorder %s210_s9, %s671_s14 }
  0x30   : > { %s676_s1 = sshll.u32 %s805_s11, 4  ;;  %s677_s1 = int_to_ptr.vmem [resolvable:$false] %s676_s1 }
  0x31   : > { %p674_p7 = pnand %p672_p5, %p660_p3  ;;  %s678_s29 = scalar_lea.vmem %s677_s1, 256 }
  0x32   : > { %p679_p4 = scmp.lt.s32.totalorder %s210_s9, %s677_s1  ;;  %p680_p9 = scmp.lt.s32.totalorder %s678_s29, %s671_s14 }
  0x33   : > { %p675_p6 = pneg %p674_p7 }
  0x34   : > { %p681_p11 = por %p680_p9, %p679_p4 }
  0x36   : > { %p682_p10 = pnand %p681_p11, %p675_p6 }
  0x38   : > { %685 = shalt.err (!%p682_p10)
}
  0x39   : > { %568 = dma.hbm_to_vmem [thread:$0]  (!%p938_p2), %s207_s7, 128, %s210_s9, %s198_s10  }
  0x3a   : > { %218 = sbr.rel (%p888_p8) target bundleno = 329 (0x149), region = 32  ;;  %s949_s12 = sand.u32 (!%p888_p8), 1, %s784_s16  }
  0x3b   : > { %s952_s21 = sshll.u32 (!%p888_p8), %s949_s12, 3  ;;  %s221_s1 = scalar_lea.sflag (!%p888_p8), [#allocation3], %s949_s12 }
  0x3c   : > { %s224_s22 = scalar_lea.vmem (!%p888_p8), [#allocation2], %s952_s21  ;;  %p1072_p12 = scmp.ne.s32.totalorder (!%p888_p8), %s1064_s25, 0 }
  0x3f   : > { %763 = dma.done.wait (%p1072_p12), %s221_s1, 128  }
  0x40   : > { %765 = vsyncadd (%p1072_p12), %s221_s1, 4294967168 }
  0x41   : > { %767 = dma.done.wait (%p868_p1), [#allocation6], 4096  }
  0x42   : > { %769 = vsyncadd (%p868_p1), [#allocation6], 4294963200  ;;  %v806_v0 = vmov 0.0   ;;  %v290_v1 = vld [vmem:[#allocation5 + $0xf8] sm:$0xff]  ;;  %v289_v2 = vld [vmem:[#allocation5 + $0xf0] sm:$0xff]  ;;  %v293_v34 = vlaneseq  ;;  %s547_s27 = sshll.u32 %s792_s18, 7 }
  0x43   : > { %367 = vmatprep.mubr.f32.mxu0 %v806_v0  ;;  %v288_v3 = vld [vmem:[#allocation5 + $0xe8] sm:$0xff]  ;;  %303 = vmatprep.subr.mxu0 %v290_v1  ;;  %v287_v4 = vld [vmem:[#allocation5 + $0xe0] sm:$0xff]  ;;  %v286_v5 = vld [vmem:[#allocation5 + $0xd8] sm:$0xff]  ;;  %s250_s30 = scalar_lea.vmem [#allocation7], %s952_s21  ;;  %s257_s7 = scalar_lea.vmem [#allocation8], %s952_s21 }
  0x44   : > { %304 = vmatpush1.msra.mxu0 %v289_v2  ;;  %v285_v6 = vld [vmem:[#allocation5 + $0xd0] sm:$0xff]  ;;  %v284_v7 = vld [vmem:[#allocation5 + $0xc8] sm:$0xff]  ;;  %v283_v8 = vld [vmem:[#allocation5 + $0xc0] sm:$0xff]  ;;  %v294_v35 = vshrl.u32 %v293_v34, 7  ;;  %s396_s6 = sshll.u32 %s250_s30, 4  ;;  %s410_s8 = sshll.u32 %s257_s7, 4  ;;  %s979_s6 = int_to_ptr.vmem [resolvable:$true] %s396_s6  ;;  %s986_s8 = int_to_ptr.vmem [resolvable:$true] %s410_s8 }
  0x45   : > { %305 = vmatprep.subr.mxu0 %v288_v3  ;;  %v282_v9 = vld [vmem:[#allocation5 + $0xb8] sm:$0xff]  ;;  %v281_v10 = vld [vmem:[#allocation5 + $0xb0] sm:$0xff]  ;;  %v280_v11 = vld [vmem:[#allocation5 + $0xa8] sm:$0xff]  ;;  %s977_s10 = scalar_lea.hbm %s1058_s3, %s547_s27  ;;  %s984_s11 = scalar_lea.hbm %s1059_s4, %s547_s27 }
  0x46   : > { %306 = vmatpush1.msra.mxu0 %v287_v4  ;;  %v279_v12 = vld [vmem:[#allocation5 + $0xa0] sm:$0xff]  ;;  %v278_v13 = vld [vmem:[#allocation5 + $0x98] sm:$0xff]  ;;  %v277_v14 = vld [vmem:[#allocation5 + $0x90] sm:$0xff]  ;;  %v295_v36 = vsub.s32 0, %v294_v35  ;;  %v299_v38 = vsub.s32 1, %v294_v35  ;;  %s377_s29 = scalar_lea.sflag [#allocation4], %s949_s12 }
  0x47   : > { %307 = vmatprep.subr.mxu0 %v286_v5  ;;  %v276_v15 = vld [vmem:[#allocation5 + $0x88] sm:$0xff]  ;;  %v275_v16 = vld [vmem:[#allocation5 + $0x80] sm:$0xff]  ;;  %v274_v17 = vld [vmem:[#allocation5 + $0x78] sm:$0xff]  ;;  %s686_s1 = scalar_lea.vmem %s979_s6, 128 }
  0x48   : > { %308 = vmatpush1.msra.mxu0 %v285_v6  ;;  %v273_v18 = vld [vmem:[#allocation5 + $0x70] sm:$0xff]  ;;  %v272_v19 = vld [vmem:[#allocation5 + $0x68] sm:$0xff]  ;;  %v271_v20 = vld [vmem:[#allocation5 + $0x60] sm:$0xff]  ;;  %p687_p1 = scmp.ne.s32.totalorder %s979_s6, %s686_s1 }
  0x49   : > { %309 = vmatprep.subr.mxu0 %v284_v7  ;;  %v270_v21 = vld [vmem:[#allocation5 + $0x58] sm:$0xff]  ;;  %v269_v22 = vld [vmem:[#allocation5 + $0x50] sm:$0xff]  ;;  %v268_v23 = vld [vmem:[#allocation5 + $0x48] sm:$0xff] }
  0x4a   : > { %310 = vmatpush1.msra.mxu0 %v283_v8  ;;  %v267_v24 = vld [vmem:[#allocation5 + $0x40] sm:$0xff]  ;;  %v266_v25 = vld [vmem:[#allocation5 + $0x38] sm:$0xff]  ;;  %v265_v26 = vld [vmem:[#allocation5 + $0x30] sm:$0xff]  ;;  %p688_p8 = pnand %p687_p1, %p921_p13 }
  0x4b   : > { %311 = vmatprep.subr.mxu0 %v282_v9  ;;  %v264_v27 = vld [vmem:[#allocation5 + $0x28] sm:$0xff]  ;;  %v263_v28 = vld [vmem:[#allocation5 + $0x20] sm:$0xff]  ;;  %v262_v29 = vld [vmem:[#allocation5 + $0x18] sm:$0xff] }
  0x4c   : > { %312 = vmatpush1.msra.mxu0 %v281_v10  ;;  %v261_v30 = vld [vmem:[#allocation5 + $0x10] sm:$0xff]  ;;  %v260_v31 = vld [vmem:[#allocation5 + $0x8] sm:$0xff]  ;;  %v259_v32 = vld [vmem:[#allocation5] sm:$0xff]  ;;  %p689_p10 = pneg %p688_p8 }
  0x4d   : > { %313 = vmatprep.subr.mxu0 %v280_v11  ;;  %v258_v33 = vld [vmem:[%s224_s22] sm:$0xff]  ;;  %s807_s22 = smov [#allocation7]  }
  0x4e   : > { %314 = vmatpush1.msra.mxu0 %v279_v12  ;;  %v291_v37 = vld [vmem:[%s1057_s2] sm:$0x3]  ;;  %s690_s23 = sshll.u32 %s807_s22, 4  ;;  %s691_s23 = int_to_ptr.vmem [resolvable:$false] %s690_s23 }
  0x4f   : > { %315 = vmatprep.subr.mxu0 %v278_v13  ;;  %v296_v39 = vrot.slane %v291_v37, %v295_v36  ;;  %v300_v40 = vrot.slane %v291_v37, %v299_v38  ;;  %s692_s25 = scalar_lea.vmem %s691_s23, 256  ;;  %p693_p0 = scmp.lt.s32.totalorder %s979_s6, %s691_s23 }
  0x50   : > { %316 = vmatpush1.msra.mxu0 %v277_v14  ;;  %p694_p2 = scmp.lt.s32.totalorder %s692_s25, %s686_s1 }
  0x51   : > { %317 = vmatprep.subr.mxu0 %v276_v15 }
  0x52   : > { %318 = vmatpush1.msra.mxu0 %v275_v16  ;;  %p695_p3 = por %p694_p2, %p693_p0 }
  0x53   : > { %319 = vmatprep.subr.mxu0 %v274_v17 }
  0x54   : > { %320 = vmatpush1.msra.mxu0 %v273_v18  ;;  %p696_p5 = pnand %p695_p3, %p689_p10 }
  0x55   : > { %321 = vmatprep.subr.mxu0 %v272_v19 }
  0x56   : > { %322 = vmatpush1.msra.mxu0 %v271_v20 }
  0x57   : > { %323 = vmatprep.subr.mxu0 %v270_v21 }
  0x58   : > { %324 = vmatpush1.msra.mxu0 %v269_v22 }
  0x59   : > { %325 = vmatprep.subr.mxu0 %v268_v23 }
  0x5a   : > { %326 = vmatpush1.msra.mxu0 %v267_v24 }
  0x5b   : > { %327 = vmatprep.subr.mxu0 %v266_v25 }
  0x5c   : > { %328 = vmatpush1.msra.mxu0 %v265_v26 }
  0x5d   : > { %329 = vmatprep.subr.mxu0 %v264_v27 }
  0x5e   : > { %330 = vmatpush1.msra.mxu0 %v263_v28 }
  0x5f   : > { %331 = vmatprep.subr.mxu0 %v262_v29 }
  0x60   : > { %332 = vmatpush1.msra.mxu0 %v261_v30 }
  0x61   : > { %333 = vmatprep.subr.mxu0 %v260_v31 }
  0x62   : > { %334 = vmatpush1.msra.mxu0 %v259_v32 }
  0x63   : > { %368 = vmatmul.mubr.f32.vlgmr.msra.gmra.mxu0 %v258_v33 }
 0x123   : > { %v369_v41 = vpop.f32.mrf.mxu0 }
 0x124   : > { %v370_v42 = vadd.f32 %v369_v41, %v296_v39 }
 0x125   : > { %v371_v43 = vpop.f32.mrf.mxu0 }
 0x126   : > { %374 = vst [vmem:[%s250_s30] sm:$0xff] %v370_v42  ;;  %v372_v44 = vadd.f32 %v371_v43, %v300_v40 }
 0x127   : > { %699 = shalt.err (!%p696_p5)
}
 0x128   : > { %s700_s27 = scalar_lea.hbm %s977_s10, 128  ;;  %s704_s24 = scalar_lea.hbm %s1058_s3, 256 }
 0x129   : > { %p701_p7 = scmp.ne.s32.totalorder %s977_s10, %s700_s27  ;;  %p705_p9 = scmp.lt.s32.totalorder %s977_s10, %s1058_s3 }
 0x12a   : > { %p706_p11 = scmp.lt.s32.totalorder %s704_s24, %s700_s27 }
 0x12b   : > { %p702_p6 = pnand %p701_p7, %p921_p13 }
 0x12c   : > { %p707_p12 = por %p706_p11, %p705_p9 }
 0x12d   : > { %p703_p4 = pneg %p702_p6 }
 0x12f   : > { %p708_p1 = pnand %p707_p12, %p703_p4 }
 0x131   : > { %711 = shalt.err (!%p708_p1)
}
 0x132   : > { %557 = dma.vmem_to_hbm [thread:$0]  (%p921_p13), %s979_s6, 128, %s977_s10, %s377_s29   ;;  %375 = vst [vmem:[%s257_s7] sm:$0xff] %v372_v44 }
 0x133   : > { %s382_s1 = scalar_lea.sflag [#allocation9], %s949_s12  ;;  %s712_s22 = scalar_lea.vmem %s986_s8, 128 }
 0x134   : > { %p713_p8 = scmp.ne.s32.totalorder %s986_s8, %s712_s22  ;;  %s808_s23 = smov [#allocation8]  }
 0x135   : > { %s716_s25 = sshll.u32 %s808_s23, 4  ;;  %s717_s25 = int_to_ptr.vmem [resolvable:$false] %s716_s25 }
 0x136   : > { %p714_p10 = pnand %p713_p8, %p921_p13  ;;  %s718_s27 = scalar_lea.vmem %s717_s25, 256 }
 0x137   : > { %p719_p2 = scmp.lt.s32.totalorder %s986_s8, %s717_s25  ;;  %p720_p3 = scmp.lt.s32.totalorder %s718_s27, %s712_s22 }
 0x138   : > { %p715_p0 = pneg %p714_p10 }
 0x139   : > { %p721_p5 = por %p720_p3, %p719_p2 }
 0x13b   : > { %p722_p7 = pnand %p721_p5, %p715_p0 }
 0x13d   : > { %725 = shalt.err (!%p722_p7)
}
 0x13e   : > { %s726_s21 = scalar_lea.hbm %s984_s11, 128  ;;  %s730_s7 = scalar_lea.hbm %s1059_s4, 256 }
 0x13f   : > { %p727_p6 = scmp.ne.s32.totalorder %s984_s11, %s726_s21  ;;  %p731_p11 = scmp.lt.s32.totalorder %s984_s11, %s1059_s4 }
 0x140   : > { %p732_p12 = scmp.lt.s32.totalorder %s730_s7, %s726_s21 }
 0x141   : > { %p728_p4 = pnand %p727_p6, %p921_p13 }
 0x142   : > { %p733_p1 = por %p732_p12, %p731_p11 }
 0x143   : > { %p729_p9 = pneg %p728_p4 }
 0x145   : > { %p734_p8 = pnand %p733_p1, %p729_p9 }
 0x147   : > { %737 = shalt.err (!%p734_p8)
}
 0x148   : > { %558 = dma.vmem_to_hbm [thread:$0]  (%p921_p13), %s986_s8, 128, %s984_s11, %s382_s1  }
 0x149 PF: > { %s422_s30 = sand.u32 1, %s780_s15   ;;  %p1073_p10 = scmp.ne.s32.totalorder %s1065_s26, 0 }
 0x14a   : > { %p1074_p0 = scmp.ge.s32.totalorder %s800_s20, 2  ;;  %s423_s9 = scalar_lea.sflag [#allocation4], %s422_s30 }
 0x14c   : > { %p570_p2 = pnand %p1074_p0, %p1073_p10 }
 0x14e   : > { %p571_p3 = pneg %p570_p2 }
 0x150   : > { %771 = dma.done.wait (%p571_p3), %s423_s9, 128  }
 0x151   : > { %773 = vsyncadd (%p571_p3), %s423_s9, 4294967168  ;;  %s432_s24 = scalar_lea.sflag [#allocation9], %s422_s30 }
 0x152   : > { %775 = dma.done.wait (%p571_p3), %s432_s24, 128  }
 0x153   : > { %777 = vsyncadd (%p571_p3), %s432_s24, 4294967168  ;;  %s25_s20 = sadd.s32 1, %s800_s20   ;;  %s1075_s15 = smov %s784_s16 }
 0x154   : > { %p22_p5 = scmp.ge.s32.totalorder %s25_s20, 4   ;;  %s1076_s16 = smov %s788_s17 }
 0x155   : > { %s1077_s17 = smov %s930_s28  ;;  %s1078_s18 = smov %s796_s19 }
 0x156   : > { %s1079_s19 = smov %s1081_s5  ;;  %24 = sbr.rel (!%p22_p5) target bundleno = 11 (0xb), region = 98 }
 0x15b   :  { %437 = vsyncpa [#allocation3], 1 }
 0x15c   :  { %439 = vsyncpa [#allocation3 + $0x1], 1 }
 0x15d   :  { %440 = vsyncpa [#allocation6], 1 }
 0x15e   :  { %441 = vsyncpa [#allocation4], 1 }
 0x15f   :  { %443 = vsyncpa [#allocation4 + $0x1], 1 }
 0x160   :  { %444 = vsyncpa [#allocation9], 1 }
 0x161   :  { %446 = vsyncpa [#allocation9 + $0x1], 1 }

</bundles_post_ra>
